<compile_context>
chip_gen: v7x
topology: tpu7x:2x2x1
jax: 0.10.0
libtpu: 0.0.40
codegen_flags: <defaults>
</compile_context>

<pallas_src>
import functools

import jax
import jax.numpy as jnp
from jax.experimental import pallas as pl
from jax.experimental.pallas import tpu as pltpu


def _round_up(x, m):
    return (x + m - 1) // m * m


# --------------------------- tiled matmul kernel ---------------------------

def _mm_kernel(x_ref, w_ref, b_ref, o_ref, acc_ref, *, act, nk):
    k = pl.program_id(2)

    @pl.when(k == 0)
    def _():
        acc_ref[...] = jnp.zeros_like(acc_ref)

    acc_ref[...] += jnp.dot(x_ref[...], w_ref[...],
                            preferred_element_type=jnp.float32)

    @pl.when(k == nk - 1)
    def _():
        y = acc_ref[...] + b_ref[...]
        if act == "relu":
            y = jnp.maximum(y, 0.0)
        elif act == "sigmoid":
            y = jax.nn.sigmoid(y)
        o_ref[...] = y.astype(o_ref.dtype)


def matmul_bias_act(x, w, b, act=None, out_dtype=jnp.bfloat16):
    """y = act(x @ w + b) with bf16 operands and f32 accumulation."""
    M, K = x.shape
    N = w.shape[1]

    # Lane-dense output: pad N up to a multiple of 128.
    Np = _round_up(N, 128)
    TN = 256 if (Np % 256 == 0 and Np >= 256) else 128

    # Row tiling (keep tiles modest so they fit v7x's smaller VMEM).
    if M <= 256:
        Mp = _round_up(M, 8)
        TM = Mp
    else:
        TM = 256
        Mp = _round_up(M, TM)

    # K tiling (only kicks in for very large contractions).
    if K <= 1024:
        Kp, TK = K, K
    else:
        TK = 512
        Kp = _round_up(K, TK)
    nk = Kp // TK

    xb = x.astype(jnp.bfloat16)
    wb = w.astype(jnp.bfloat16)
    if Mp != M or Kp != K:
        xb = jnp.zeros((Mp, Kp), jnp.bfloat16).at[:M, :K].set(xb)
    if Kp != K or Np != N:
        wb = jnp.zeros((Kp, Np), jnp.bfloat16).at[:K, :N].set(wb)
    bp = b.astype(jnp.float32)
    if Np != N:
        bp = jnp.zeros((Np,), jnp.float32).at[:N].set(bp)

    out = pl.pallas_call(
        functools.partial(_mm_kernel, act=act, nk=nk),
        out_shape=jax.ShapeDtypeStruct((Mp, Np), out_dtype),
        # weight-stationary ordering: N outer, M inner, K (reduction) last.
        grid=(Np // TN, Mp // TM, nk),
        in_specs=[
            pl.BlockSpec((TM, TK), lambda j, i, k: (i, k)),
            pl.BlockSpec((TK, TN), lambda j, i, k: (k, j)),
            pl.BlockSpec((1, TN), lambda j, i, k: (0, j)),
        ],
        out_specs=pl.BlockSpec((TM, TN), lambda j, i, k: (i, j)),
        scratch_shapes=[pltpu.VMEM((TM, TN), jnp.float32)],
        compiler_params=pltpu.CompilerParams(
            dimension_semantics=("parallel", "parallel", "arbitrary"),
            vmem_limit_bytes=32 * 1024 * 1024),
    )(xb, wb, bp.reshape(1, Np))
    return out[:M, :N]


# -------------------------- BatchNorm (training mode) ----------------------

def _bn_reduce_kernel(x_ref, s_ref, q_ref):
    @pl.when(pl.program_id(0) == 0)
    def _():
        s_ref[...] = jnp.zeros_like(s_ref)
        q_ref[...] = jnp.zeros_like(q_ref)

    x = x_ref[...].astype(jnp.float32)
    s_ref[...] += jnp.sum(x, axis=0, keepdims=True)
    q_ref[...] += jnp.sum(x * x, axis=0, keepdims=True)


def _bn_apply_kernel(x_ref, sc_ref, sh_ref, o_ref, *, relu):
    y = x_ref[...].astype(jnp.float32) * sc_ref[...] + sh_ref[...]
    if relu:
        y = jnp.maximum(y, 0.0)
    o_ref[...] = y.astype(o_ref.dtype)


def batchnorm_act(x, gamma, beta, relu=True, eps=1e-5, out_dtype=jnp.bfloat16):
    """Training-mode BatchNorm over rows (N*H*W) per channel, optional ReLU."""
    M, C = x.shape
    TM = min(512, _round_up(M, 8))
    Mp = _round_up(M, TM)
    xp = x
    if Mp != M:
        # zero padding leaves sum / sum-of-squares unchanged (true M divisor below)
        xp = jnp.zeros((Mp, C), x.dtype).at[:M].set(x)

    sums, sqs = pl.pallas_call(
        _bn_reduce_kernel,
        out_shape=(jax.ShapeDtypeStruct((1, C), jnp.float32),
                   jax.ShapeDtypeStruct((1, C), jnp.float32)),
        grid=(Mp // TM,),
        in_specs=[pl.BlockSpec((TM, C), lambda i: (i, 0))],
        out_specs=(pl.BlockSpec((1, C), lambda i: (0, 0)),
                   pl.BlockSpec((1, C), lambda i: (0, 0))),
        compiler_params=pltpu.CompilerParams(
            dimension_semantics=("arbitrary",)),
    )(xp)

    mean = sums / M
    var = jnp.maximum(sqs / M - mean * mean, 0.0)      # biased var (PyTorch train)
    scale = gamma.reshape(1, C) * jax.lax.rsqrt(var + eps)
    shift = beta.reshape(1, C) - mean * scale

    out = pl.pallas_call(
        functools.partial(_bn_apply_kernel, relu=relu),
        out_shape=jax.ShapeDtypeStruct((Mp, C), out_dtype),
        grid=(Mp // TM,),
        in_specs=[pl.BlockSpec((TM, C), lambda i: (i, 0)),
                  pl.BlockSpec((1, C), lambda i: (0, 0)),
                  pl.BlockSpec((1, C), lambda i: (0, 0))],
        out_specs=pl.BlockSpec((TM, C), lambda i: (i, 0)),
        compiler_params=pltpu.CompilerParams(
            dimension_semantics=("parallel",)),
    )(xp, scale, shift)
    return out[:M]


# --------------------- 3x3 stride-1 pad-1 conv (no im2col) ------------------

def _conv3x3_kernel(x_ref, w_ref, b_ref, o_ref, acc_ref, *, HWp, Wp):
    acc_ref[...] = jnp.zeros_like(acc_ref)
    for ky in range(3):
        for kx in range(3):
            off = ky * Wp + kx
            acc_ref[...] += jnp.dot(x_ref[0, off:off + HWp, :],
                                    w_ref[3 * ky + kx],
                                    preferred_element_type=jnp.float32)
    o_ref[0] = (acc_ref[...] + b_ref[...]).astype(o_ref.dtype)


def conv3x3_same(x, w, b):
    """3x3 conv, stride 1, pad 1.  x: (N,H,W,Cin) bf16; w PyTorch (Cout,Cin,3,3)."""
    Nb, H, W, Cin = x.shape
    Cout = w.shape[0]
    Hp, Wp = H + 2, W + 2
    HWp = H * Wp

    # spatially pad once, flatten rows, add 2 guard rows so every shifted
    # contiguous row-slice stays in bounds (guard rows only feed junk columns).
    xflat = jnp.pad(x, ((0, 0), (1, 1), (1, 1), (0, 0))).reshape(Nb, Hp * Wp, Cin)
    xflat = jnp.pad(xflat, ((0, 0), (0, 2), (0, 0)))
    wk = jnp.transpose(w, (2, 3, 1, 0)).reshape(9, Cin, Cout).astype(jnp.bfloat16)
    bb = b.astype(jnp.float32).reshape(1, Cout)

    out_wide = pl.pallas_call(
        functools.partial(_conv3x3_kernel, HWp=HWp, Wp=Wp),
        out_shape=jax.ShapeDtypeStruct((Nb, HWp, Cout), jnp.bfloat16),
        grid=(Nb,),
        in_specs=[pl.BlockSpec((1, Hp * Wp + 2, Cin), lambda n: (n, 0, 0)),
                  pl.BlockSpec((9, Cin, Cout), lambda n: (0, 0, 0)),
                  pl.BlockSpec((1, Cout), lambda n: (0, 0))],
        out_specs=pl.BlockSpec((1, HWp, Cout), lambda n: (n, 0, 0)),
        scratch_shapes=[pltpu.VMEM((HWp, Cout), jnp.float32)],
        compiler_params=pltpu.CompilerParams(
            dimension_semantics=("parallel",),
            vmem_limit_bytes=32 * 1024 * 1024),
    )(xflat, wk, bb)
    # drop the 2 junk "wide" columns per output row
    return out_wide.reshape(Nb, H, Wp, Cout)[:, :, :W, :]


# ---------------- split attention: fused GAP + fc1 + fc2 kernel -------------

def _attn_kernel(x_ref, w1_ref, b1_ref, w2_ref, b2_ref, o_ref, *, radix, C):
    x = x_ref[0].astype(jnp.float32)                 # (HW, radix*C)
    acc = x[:, 0:C]
    for r in range(1, radix):
        acc = acc + x[:, r * C:(r + 1) * C]
    gap = jnp.mean(acc, axis=0, keepdims=True)       # (1, C)
    h = jnp.dot(gap, w1_ref[...], preferred_element_type=jnp.float32) + b1_ref[...]
    h = jnp.maximum(h, 0.0)
    a = jnp.dot(h, w2_ref[...], preferred_element_type=jnp.float32) + b2_ref[...]
    o_ref[...] = jax.nn.sigmoid(a).astype(o_ref.dtype)


def split_attention_mlp(splits3, fc1_w, fc1_b, fc2_w, fc2_b, radix, C):
    """splits3: (N, HW, radix*C) -> attention (N, radix*C) (sigmoid)."""
    Nb, HW, RC = splits3.shape
    C4 = fc1_w.shape[0]
    C4p = _round_up(C4, 128)
    w1p = jnp.zeros((C, C4p), jnp.float32).at[:, :C4].set(fc1_w.T)
    b1p = jnp.zeros((1, C4p), jnp.float32).at[0, :C4].set(fc1_b)
    w2p = jnp.zeros((C4p, RC), jnp.float32).at[:C4, :].set(fc2_w.T)
    b2p = fc2_b.astype(jnp.float32).reshape(1, RC)

    return pl.pallas_call(
        functools.partial(_attn_kernel, radix=radix, C=C),
        out_shape=jax.ShapeDtypeStruct((Nb, RC), jnp.float32),
        grid=(Nb,),
        in_specs=[pl.BlockSpec((1, HW, RC), lambda n: (n, 0, 0)),
                  pl.BlockSpec((C, C4p), lambda n: (0, 0)),
                  pl.BlockSpec((1, C4p), lambda n: (0, 0)),
                  pl.BlockSpec((C4p, RC), lambda n: (0, 0)),
                  pl.BlockSpec((1, RC), lambda n: (0, 0))],
        out_specs=pl.BlockSpec((1, RC), lambda n: (n, 0)),
        compiler_params=pltpu.CompilerParams(
            dimension_semantics=("parallel",)),
    )(splits3, w1p, b1p, w2p, b2p)


# ------------- combine: relu(sum_r splits_r * atten_r + shortcut) -----------

def _combine_kernel(x_ref, a_ref, s_ref, o_ref, *, radix, C):
    x = x_ref[0].astype(jnp.float32)                 # (HW, radix*C)
    a = a_ref[...]                                   # (1, radix*C)  (per-image)
    acc = s_ref[0].astype(jnp.float32)               # (HW, C)
    for r in range(radix):
        sl = slice(r * C, (r + 1) * C)
        acc = acc + x[:, sl] * a[:, sl]
    o_ref[0] = jnp.maximum(acc, 0.0).astype(o_ref.dtype)


def split_attention_combine(splits3, att, sc3, radix, C):
    Nb, HW, RC = splits3.shape
    return pl.pallas_call(
        functools.partial(_combine_kernel, radix=radix, C=C),
        out_shape=jax.ShapeDtypeStruct((Nb, HW, C), jnp.bfloat16),
        grid=(Nb,),
        in_specs=[pl.BlockSpec((1, HW, RC), lambda n: (n, 0, 0)),
                  pl.BlockSpec((1, RC), lambda n: (n, 0)),
                  pl.BlockSpec((1, HW, C), lambda n: (n, 0, 0))],
        out_specs=pl.BlockSpec((1, HW, C), lambda n: (n, 0, 0)),
        compiler_params=pltpu.CompilerParams(
            dimension_semantics=("parallel",)),
    )(splits3, att, sc3)


# ---------------- head: fused adaptive-avg-pool + linear --------------------

def _head_kernel(x_ref, w_ref, b_ref, o_ref):
    feat = jnp.mean(x_ref[0].astype(jnp.float32), axis=0, keepdims=True)  # (1, C)
    o_ref[...] = jnp.dot(feat, w_ref[...],
                         preferred_element_type=jnp.float32) + b_ref[...]


def head_pool_linear(y3, w, b):
    """y3: (N, HW, C); w: (num_classes, C) -> logits (N, num_classes) f32."""
    Nb, HW, C = y3.shape
    ncls = w.shape[0]
    NCp = _round_up(ncls, 128)
    wp = jnp.zeros((C, NCp), jnp.float32).at[:, :ncls].set(w.T)
    bp = jnp.zeros((1, NCp), jnp.float32).at[0, :ncls].set(b)
    out = pl.pallas_call(
        _head_kernel,
        out_shape=jax.ShapeDtypeStruct((Nb, NCp), jnp.float32),
        grid=(Nb,),
        in_specs=[pl.BlockSpec((1, HW, C), lambda n: (n, 0, 0)),
                  pl.BlockSpec((C, NCp), lambda n: (0, 0)),
                  pl.BlockSpec((1, NCp), lambda n: (0, 0))],
        out_specs=pl.BlockSpec((1, NCp), lambda n: (n, 0)),
        compiler_params=pltpu.CompilerParams(
            dimension_semantics=("parallel",)),
    )(y3, wp, bp)
    return out[:, :ncls]


# ------------------------------ JAX glue ------------------------------------

def im2col(x, kh, kw, stride, pad):
    """x:(N,H,W,C) -> (N,Ho,Wo,kh*kw*C), patch channel order (ky, kx, c)."""
    N, H, W, C = x.shape
    xp = jnp.pad(x, ((0, 0), (pad, pad), (pad, pad), (0, 0)))
    Ho = (H + 2 * pad - kh) // stride + 1
    Wo = (W + 2 * pad - kw) // stride + 1
    cols = []
    for ky in range(kh):
        for kx in range(kw):
            cols.append(xp[:, ky:ky + stride * Ho:stride,
                           kx:kx + stride * Wo:stride, :])
    return jnp.concatenate(cols, axis=-1), Ho, Wo


def resnest_block(x, p, out_c, stride=2, radix=2):
    """ResNeStBlock forward (split attention).  x: NHWC bf16."""
    Nb = x.shape[0]
    in_c = x.shape[-1]

    # 1x1 strided conv input == subsampled activation (shared with shortcut).
    # TODO(synk): the stride-2 subsample is an XLA slice; could be folded into
    # a BlockSpec/pl.ds(stride=2) load, but it is a 4x data reduction already.
    xs = x[:, ::stride, ::stride, :]
    Ho, Wo = xs.shape[1], xs.shape[2]
    rows = Nb * Ho * Wo
    xrows = xs.reshape(rows, in_c)

    # conv1 (1x1 strided) + bn1 + relu
    w1 = p["conv1_w"].reshape(out_c, in_c).T
    y = matmul_bias_act(xrows, w1, p["conv1_b"])
    y = batchnorm_act(y, p["bn1_g"], p["bn1_b"], relu=True)

    # conv2 (3x3, pad 1) + bn2 + relu  ->  radix*out_c channels
    z = conv3x3_same(y.reshape(Nb, Ho, Wo, out_c), p["conv2_w"], p["conv2_b"])
    splits = batchnorm_act(z.reshape(rows, radix * out_c),
                           p["bn2_g"], p["bn2_b"], relu=True)
    splits3 = splits.reshape(Nb, Ho * Wo, radix * out_c)

    # split attention: fused GAP -> fc1(relu) -> fc2(sigmoid)
    att = split_attention_mlp(splits3, p["fc1_w"], p["fc1_b"],
                              p["fc2_w"], p["fc2_b"], radix, out_c)

    # shortcut: 1x1 strided conv + BN (no relu)
    wsc = p["sc_w"].reshape(out_c, in_c).T
    sc = matmul_bias_act(xrows, wsc, p["sc_b"])
    sc = batchnorm_act(sc, p["sc_bn_g"], p["sc_bn_b"], relu=False)
    sc3 = sc.reshape(Nb, Ho * Wo, out_c)

    out = split_attention_combine(splits3, att, sc3, radix, out_c)
    return out.reshape(Nb, Ho, Wo, out_c)


def resnest4layer_forward(x_nchw, params, dim):
    x = jnp.transpose(x_nchw, (0, 2, 3, 1)).astype(jnp.bfloat16)  # NCHW -> NHWC
    Nb = x.shape[0]

    # stem: 3x3 stride-2 conv (Cin=3 -> im2col is tiny) + BN + ReLU
    cols, Ho, Wo = im2col(x, 3, 3, stride=2, pad=1)
    w = params["stem_w"]
    wmat = jnp.transpose(w, (2, 3, 1, 0)).reshape(-1, w.shape[0])
    y = matmul_bias_act(cols.reshape(Nb * Ho * Wo, -1), wmat, params["stem_b"])
    y = batchnorm_act(y, params["stem_bn_g"], params["stem_bn_b"], relu=True)
    y = y.reshape(Nb, Ho, Wo, dim)

    y = resnest_block(y, params["block1"], out_c=dim * 2, stride=2, radix=2)
    y = resnest_block(y, params["block2"], out_c=dim * 4, stride=2, radix=2)

    # head: fused adaptive avg pool (1x1) + flatten + linear
    Nb, H, W, C = y.shape
    logits = head_pool_linear(y.reshape(Nb, H * W, C),
                              params["head_w"], params["head_b"])
    return logits


# --------------------------- parameter init ---------------------------------

def init_params(key, dim, num_classes):
    keys = iter(jax.random.split(key, 64))

    def conv(co, ci, kh, kw):
        fan_in = ci * kh * kw
        w = jax.random.normal(next(keys), (co, ci, kh, kw), jnp.float32) / jnp.sqrt(fan_in)
        b = 0.01 * jax.random.normal(next(keys), (co,), jnp.float32)
        return w, b

    def bn(c):  # PyTorch BatchNorm2d default init: gamma=1, beta=0
        return jnp.ones((c,), jnp.float32), jnp.zeros((c,), jnp.float32)

    def block(in_c, out_c, radix=2):
        p = {}
        p["conv1_w"], p["conv1_b"] = conv(out_c, in_c, 1, 1)
        p["bn1_g"], p["bn1_b"] = bn(out_c)
        p["conv2_w"], p["conv2_b"] = conv(out_c * radix, out_c, 3, 3)
        p["bn2_g"], p["bn2_b"] = bn(out_c * radix)
        w, b = conv(out_c // 4, out_c, 1, 1)
        p["fc1_w"], p["fc1_b"] = w.reshape(out_c // 4, out_c), b
        w, b = conv(out_c * radix, out_c // 4, 1, 1)
        p["fc2_w"], p["fc2_b"] = w.reshape(out_c * radix, out_c // 4), b
        p["sc_w"], p["sc_b"] = conv(out_c, in_c, 1, 1)
        p["sc_bn_g"], p["sc_bn_b"] = bn(out_c)
        return p

    params = {}
    params["stem_w"], params["stem_b"] = conv(dim, 3, 3, 3)
    params["stem_bn_g"], params["stem_bn_b"] = bn(dim)
    params["block1"] = block(dim, dim * 2)
    params["block2"] = block(dim * 2, dim * 4)
    hw = jax.random.normal(next(keys), (num_classes, dim * 4), jnp.float32) / jnp.sqrt(dim * 4)
    hb = 0.01 * jax.random.normal(next(keys), (num_classes,), jnp.float32)
    params["head_w"], params["head_b"] = hw, hb
    return params


# --------------------------------- main --------------------------------------

if __name__ == "__main__":
    dim, num_classes = 32, 10          # small synthetic config (module default: 128 / 100)
    key = jax.random.PRNGKey(0)
    pkey, xkey = jax.random.split(key)
    params = init_params(pkey, dim, num_classes)

    x = jax.random.normal(xkey, (2, 3, 16, 16), jnp.float32)   # NCHW, like PyTorch
    logits = resnest4layer_forward(x, params, dim)
    logits = jax.block_until_ready(logits)

    assert logits.shape == (2, num_classes)
    assert bool(jnp.all(jnp.isfinite(logits)))
    print("KERNEL_OK")
</pallas_src>

<mosaic_0001>
module attributes {stable_mosaic.version = 11 : i64} {
  func.func @_mm_kernel(%arg0: i32, %arg1: i32, %arg2: i32, %arg3: memref<128x27xbf16, #tpu.memory_space<vmem>>, %arg4: memref<27x128xbf16, #tpu.memory_space<vmem>>, %arg5: memref<1x128xf32, #tpu.memory_space<vmem>>, %arg6: memref<128x128xbf16, #tpu.memory_space<vmem>>, %arg7: memref<128x128xf32, #tpu.memory_space<vmem>>) attributes {dimension_semantics = [#tpu.dimension_semantics<parallel>, #tpu.dimension_semantics<parallel>, #tpu.dimension_semantics<arbitrary>], iteration_bounds = array<i64: 1, 1, 1>, scalar_prefetch = 0 : i64, scratch_operands = 1 : i64, tpu.core_type = #tpu.core_type<tc>, window_params = [{transform_indices = @transform_0, window_bounds = array<i64: 128, 27>}, {transform_indices = @transform_1, window_bounds = array<i64: 27, 128>}, {transform_indices = @transform_2, window_bounds = array<i64: 1, 128>}, {transform_indices = @transform_3, window_bounds = array<i64: 128, 128>}]} {
    %c0_i32 = arith.constant 0 : i32
    %0 = arith.cmpi eq, %arg2, %c0_i32 : i32
    %1 = arith.extui %0 : i1 to i32
    %c0_i32_0 = arith.constant 0 : i32
    %2 = arith.cmpi ne, %1, %c0_i32_0 : i32
    scf.if %2 {
      %cst_10 = arith.constant 0.000000e+00 : f32
      %12 = vector.broadcast %cst_10 : f32 to vector<128x128xf32>
      %c0_11 = arith.constant 0 : index
      %c0_12 = arith.constant 0 : index
      %13 = vector.load %arg7[%c0_11, %c0_12] : memref<128x128xf32, #tpu.memory_space<vmem>>, vector<128x128xf32>
      tpu.vector_store %arg7[%c0_11, %c0_12], %12 {strides = array<i32>} : memref<128x128xf32, #tpu.memory_space<vmem>>, vector<128x128xf32>,
    } else {
    }
    %c0 = arith.constant 0 : index
    %c0_1 = arith.constant 0 : index
    %3 = vector.load %arg7[%c0, %c0_1] : memref<128x128xf32, #tpu.memory_space<vmem>>, vector<128x128xf32>
    %c0_2 = arith.constant 0 : index
    %c0_3 = arith.constant 0 : index
    %4 = vector.load %arg3[%c0_2, %c0_3] : memref<128x27xbf16, #tpu.memory_space<vmem>>, vector<128x27xbf16>
    %c0_4 = arith.constant 0 : index
    %c0_5 = arith.constant 0 : index
    %5 = vector.load %arg4[%c0_4, %c0_5] : memref<27x128xbf16, #tpu.memory_space<vmem>>, vector<27x128xbf16>
    %cst = arith.constant dense<0.000000e+00> : vector<128x128xf32>
    %6 = tpu.matmul %4, %5, %cst {dimension_numbers = #tpu.dot_dimension_numbers<[1], [0], [0], [1], [0, 0, 1, 1], [], []>} : vector<128x27xbf16>, vector<27x128xbf16>, vector<128x128xf32> -> vector<128x128xf32>
    %7 = arith.addf %3, %6 : vector<128x128xf32>
    %c0_6 = arith.constant 0 : index
    %c0_7 = arith.constant 0 : index
    %8 = vector.load %arg7[%c0_6, %c0_7] : memref<128x128xf32, #tpu.memory_space<vmem>>, vector<128x128xf32>
    tpu.vector_store %arg7[%c0_6, %c0_7], %7 {strides = array<i32>} : memref<128x128xf32, #tpu.memory_space<vmem>>, vector<128x128xf32>,
    %c0_i32_8 = arith.constant 0 : i32
    %9 = arith.cmpi eq, %arg2, %c0_i32_8 : i32
    %10 = arith.extui %9 : i1 to i32
    %c0_i32_9 = arith.constant 0 : i32
    %11 = arith.cmpi ne, %10, %c0_i32_9 : i32
    scf.if %11 {
      %c0_10 = arith.constant 0 : index
      %c0_11 = arith.constant 0 : index
      %12 = vector.load %arg7[%c0_10, %c0_11] : memref<128x128xf32, #tpu.memory_space<vmem>>, vector<128x128xf32>
      %c0_12 = arith.constant 0 : index
      %c0_13 = arith.constant 0 : index
      %13 = vector.load %arg5[%c0_12, %c0_13] : memref<1x128xf32, #tpu.memory_space<vmem>>, vector<1x128xf32>
      %14 = vector.broadcast %13 : vector<1x128xf32> to vector<128x128xf32>
      %15 = arith.addf %12, %14 : vector<128x128xf32>
      %16 = arith.truncf %15 : vector<128x128xf32> to vector<128x128xbf16>
      %c0_14 = arith.constant 0 : index
      %c0_15 = arith.constant 0 : index
      %17 = vector.load %arg6[%c0_14, %c0_15] : memref<128x128xbf16, #tpu.memory_space<vmem>>, vector<128x128xbf16>
      tpu.vector_store %arg6[%c0_14, %c0_15], %16 {strides = array<i32>} : memref<128x128xbf16, #tpu.memory_space<vmem>>, vector<128x128xbf16>,
    } else {
    }
    return
  }
  func.func @transform_0(%arg0: i32, %arg1: i32, %arg2: i32) -> (i32, i32) {
    %c0_i32 = arith.constant 0 : i32
    return %arg1, %arg2 : i32, i32
  }
  func.func @transform_1(%arg0: i32, %arg1: i32, %arg2: i32) -> (i32, i32) {
    %c0_i32 = arith.constant 0 : i32
    return %arg2, %arg0 : i32, i32
  }
  func.func @transform_2(%arg0: i32, %arg1: i32, %arg2: i32) -> (i32, i32) {
    %c0_i32 = arith.constant 0 : i32
    %c0_i32_0 = arith.constant 0 : i32
    return %c0_i32, %arg0 : i32, i32
  }
  func.func @transform_3(%arg0: i32, %arg1: i32, %arg2: i32) -> (i32, i32) {
    %c0_i32 = arith.constant 0 : i32
    return %arg1, %arg0 : i32, i32
  }
}

</mosaic_0001>

<bundles_post_ra>
// kernel: tpu_custom_call.1
= control target key start
LH: loop header
LB: loop body
LE: loop exit
PB: predicated region body
PF: predicated region fallthrough
CT: control target
= control target key end

     0   :  { %vm148_vm0 = vcmask 1044480   ;;  %vm149_vm1 = vcmask 1045504   ;;  %v592_v2 = vmov 65535   ;;  %vm123_vm2 = vcmask 220160   ;;  %s669_s0 = inlined_call_operand.vmem [shape: bf16[128,27], index: 0, kind: input, shape index: {}]   ;;  %s670_s1 = inlined_call_operand.vmem [shape: bf16[27,128], index: 1, kind: input, shape index: {}]   ;;  %s671_s2 = inlined_call_operand.vmem [shape: f32[1,128], index: 2, kind: input, shape index: {}]   ;;  %s672_s3 = inlined_call_operand.hbm [shape: bf16[128,128], index: 3, kind: output, shape index: {}]  }
   0x1   :  { %v558_v0 = vld [vmem:[%s670_s1] sm:$0xff]   ;;  %v559_v1 = vld [vmem:[%s670_s1 + $0x8] sm:$0x3f]   ;;  %v150_v3 = vsel %vm148_vm0, 4294967295, %v592_v2  ;;  %v564_v10 = vld [vmem:[%s669_s0 + $0x10] sm:$0xff]  }
   0x2   :  { %530 = vmatprep.subr.bf16.mxu0 %v558_v0  ;;  %550 = vmatprep.subr.bf16.mxu1 %v558_v0  ;;  %v560_v4 = vld [vmem:[%s669_s0] sm:$0xff]   ;;  %v151_v6 = vsel %vm149_vm1, %v150_v3, 0  ;;  %v562_v8 = vld [vmem:[%s669_s0 + $0x8] sm:$0xff]   ;;  %v565_v11 = vld [vmem:[%s669_s0 + $0x30] sm:$0xff]  }
   0x3   :  { %531 = vmatpush3.bf16.msra.mxu0 %v558_v0  ;;  %552 = vmatpush3.bf16.msra.mxu1 %v558_v0  ;;  %v561_v5 = vld [vmem:[%s669_s0 + $0x20] sm:$0xff]   ;;  %v153_v7 = vand.u32 %v559_v1, %v151_v6  ;;  %v563_v9 = vld [vmem:[%s669_s0 + $0x28] sm:$0xff]  }
   0x4   :  { %534 = vmatprep.mubr.msk.bf16.mxu0 %vm123_vm2, %v560_v4  ;;  %542 = vmatprep.mubr.msk.bf16.mxu1 %vm123_vm2, %v561_v5 }
   0x5   :  { %532 = vmatprep.subr.bf16.mxu0 %v153_v7  ;;  %551 = vmatprep.subr.bf16.mxu1 %v153_v7 }
   0x7   :  { %533 = vmatpush3.bf16.msra.mxu0 %v153_v7  ;;  %553 = vmatpush3.bf16.msra.mxu1 %v153_v7 }
   0x8   :  { %8 = vsyncpa [#allocation4], 0  ;;  %v566_v12 = vld [vmem:[%s669_s0 + $0x18] sm:$0xff]   ;;  %v440_v15 = vld [vmem:[%s671_s2] ss:$0 sm:$0xff] }
   0x9   :  { %v567_v13 = vld [vmem:[%s669_s0 + $0x38] sm:$0xff]   ;;  %s593_s0 = smov [#allocation3]  }
   0xa   :  { %535 = vmatmul.mubr.msk.bf16.vlgmr.msra.gmra.mrb[0].mxu0 %vm123_vm2, %v562_v8  ;;  %543 = vmatmul.mubr.msk.bf16.vlgmr.msra.gmra.mrb[0].mxu1 %vm123_vm2, %v563_v9  ;;  %s411_s2 = sshll.u32 %s593_s0, 4  ;;  %s412_s2 = int_to_ptr.vmem [resolvable:$true] %s411_s2 }
   0xb   :  { %538 = vmatprep.mubr.msk.bf16.mxu0 %vm123_vm2, %v564_v10  ;;  %546 = vmatprep.mubr.msk.bf16.mxu1 %vm123_vm2, %v565_v11  ;;  %s568_s6 = scalar_lea.vmem %s412_s2, 1024  ;;  %p573_p1 = scmp.lt.s32.totalorder %s412_s2, %s412_s2 }
   0xc   :  { %p569_p0 = scmp.ne.s32.totalorder %s412_s2, %s568_s6  ;;  %p574_p2 = scmp.lt.s32.totalorder %s568_s6, %s568_s6 }
   0xe   :  { %p575_p3 = por %p574_p2, %p573_p1 }
  0x10   :  { %p576_p4 = pnand %p575_p3, %p569_p0 }
  0x12   :  { %539 = vmatmul.mubr.msk.bf16.gmra.mrb[4].mxu0 %vm123_vm2, %v566_v12  ;;  %547 = vmatmul.mubr.msk.bf16.gmra.mrb[4].mxu1 %vm123_vm2, %v567_v13 }
  0xdd   :  { %v536_v14 = vpop.f32.mrb[0].mxu0  ;;  %v544_v16 = vpop.f32.mrb[0].mxu1 }
  0xde   :  { %v189_v17 = vpop.f32.mrb[1].mxu0  ;;  %v221_v18 = vpop.f32.mrb[1].mxu1  ;;  %v312_v21 = vadd.f32 %v536_v14, %v440_v15  ;;  %v320_v22 = vadd.f32 %v544_v16, %v440_v15 }
  0xdf   :  { %v537_v19 = vpop.f32.mrb[2].mxu0  ;;  %v545_v20 = vpop.f32.mrb[2].mxu1  ;;  %v310_v27 = vadd.f32 %v440_v15, %v189_v17  ;;  %v318_v28 = vadd.f32 %v440_v15, %v221_v18 }
  0xe0   :  { %v313_v23 = vadd.f32 %v537_v19, %v440_v15  ;;  %v321_v24 = vadd.f32 %v545_v20, %v440_v15  ;;  %v192_v25 = vpop.f32.mrb[3].mxu0  ;;  %v224_v26 = vpop.f32.mrb[3].mxu1 }
  0xe1   :  { %v311_v29 = vadd.f32 %v440_v15, %v192_v25  ;;  %v319_v30 = vadd.f32 %v440_v15, %v224_v26 }
  0xe2   :  { %v481_v31 = vpack.c.bf16 %v313_v23, %v312_v21  ;;  %v501_v32 = vpack.c.bf16 %v321_v24, %v320_v22 }
  0xe3   :  { %v476_v33 = vpack.c.bf16 %v311_v29, %v310_v27  ;;  %v496_v34 = vpack.c.bf16 %v319_v30, %v318_v28 }
  0xe4   :  { %513 = vst [vmem:[#allocation3 + $0x8] sm:$0xff] %v481_v31   ;;  %517 = vst [vmem:[#allocation3 + $0x28] sm:$0xff] %v501_v32  }
  0xe5   :  { %477 = vst [vmem:[#allocation3] sm:$0xff] %v476_v33   ;;  %516 = vst [vmem:[#allocation3 + $0x20] sm:$0xff] %v496_v34   ;;  %v540_v35 = vpop.f32.mrb[4].mxu0  ;;  %v548_v36 = vpop.f32.mrb[4].mxu1 }
  0xe6   :  { %v205_v37 = vpop.f32.mrb[5].mxu0  ;;  %v237_v38 = vpop.f32.mrb[5].mxu1  ;;  %v316_v41 = vadd.f32 %v540_v35, %v440_v15  ;;  %v324_v42 = vadd.f32 %v548_v36, %v440_v15 }
  0xe7   :  { %v541_v39 = vpop.f32.mrb[6].mxu0  ;;  %v549_v40 = vpop.f32.mrb[6].mxu1  ;;  %v314_v47 = vadd.f32 %v440_v15, %v205_v37  ;;  %v322_v48 = vadd.f32 %v440_v15, %v237_v38 }
  0xe8   :  { %v317_v43 = vadd.f32 %v541_v39, %v440_v15  ;;  %v325_v44 = vadd.f32 %v549_v40, %v440_v15  ;;  %v208_v45 = vpop.f32.mrb[7].mxu0  ;;  %v240_v46 = vpop.f32.mrb[7].mxu1 }
  0xe9   :  { %v315_v49 = vadd.f32 %v440_v15, %v208_v45  ;;  %v323_v50 = vadd.f32 %v440_v15, %v240_v46 }
  0xea   :  { %v491_v51 = vpack.c.bf16 %v317_v43, %v316_v41  ;;  %v511_v52 = vpack.c.bf16 %v325_v44, %v324_v42 }
  0xeb   :  { %v486_v53 = vpack.c.bf16 %v315_v49, %v314_v47  ;;  %v506_v54 = vpack.c.bf16 %v323_v50, %v322_v48 }
  0xec   :  { %515 = vst [vmem:[#allocation3 + $0x18] sm:$0xff] %v491_v51   ;;  %519 = vst [vmem:[#allocation3 + $0x38] sm:$0xff] %v511_v52  }
  0xed   :  { %514 = vst [vmem:[#allocation3 + $0x10] sm:$0xff] %v486_v53   ;;  %518 = vst [vmem:[#allocation3 + $0x30] sm:$0xff] %v506_v54  }
  0xee   :  { %579 = shalt.err (!%p576_p4)
}
  0xef   :  { %s580_s9 = scalar_lea.hbm %s672_s3, 1024 }
  0xf0   :  { %p581_p5 = scmp.ne.s32.totalorder %s672_s3, %s580_s9  ;;  %p584_p6 = scmp.lt.u32.totalorder %s580_s9, %s672_s3 }
  0xf2   :  { %p586_p7 = pnand %p584_p6, %p581_p5 }
  0xf4   :  { %589 = shalt.err (!%p586_p7)
}
  0xf5   :  { %s594_s14 = smov 64   ;;  %s595_s15 = smov 4  }
  0xf6   :  { %417 = dma.vmem_to_hbm [thread:$0]  %s412_s2, 1024, %s672_s3, [#allocation4], %s594_s14, %s594_s14, %s595_s15  }
  0xf7   :  { %590 = dma.done.wait [#allocation4], 1024  }
  0xf8   :  { %591 = vsyncadd [#allocation4], 4294966272 }
  0xf9   :  { %421 = vsyncpa [#allocation4], 1 }

</bundles_post_ra>
